<compile_context>
chip_gen: v7x
topology: tpu7x:2x2x1
jax: 0.10.0
libtpu: 0.0.40
codegen_flags: <defaults>
</compile_context>

<pallas_src>
import functools

import jax
import jax.numpy as jnp
from jax.experimental import pallas as pl
from jax.experimental.pallas import tpu as pltpu


def _quadruplet_kernel(a_ref, p_ref, n1_ref, n2_ref, o_ref, *,
                       margin1, margin2, s_rows, n_inner, nb_full,
                       l_total, needs_mask):
    # Blocks are (1, C, s_rows, 128): pixels on (sublane, lane), channels on a
    # leading axis -> all VALU work and all intermediates are lane/sublane dense.
    c = pl.program_id(1)          # outer spatial chunk (parallel)
    l = pl.program_id(2)          # inner spatial chunk (arbitrary, accumulated)
    g = c * n_inner + l           # logical row-block index along the pixel axis

    a = a_ref[...].astype(jnp.float32)
    p = p_ref[...].astype(jnp.float32)
    n1 = n1_ref[...].astype(jnp.float32)
    n2 = n2_ref[...].astype(jnp.float32)

    # Per-pixel squared distances; axis=1 (channels) is a dense cross-vreg add.
    d_pos = jnp.sum((a - p) ** 2, axis=1)        # (1, s_rows, 128)
    d_neg = jnp.sum((a - n1) ** 2, axis=1)       # (1, s_rows, 128)
    d_neg_b = jnp.sum((n1 - n2) ** 2, axis=1)    # (1, s_rows, 128)

    loss = (jnp.maximum(margin1 + d_pos - d_neg, 0.0)
            + jnp.maximum(margin2 + d_pos - d_neg_b, 0.0))   # (1, s_rows, 128)

    # Per-(batch, outer-chunk) lane-wise accumulator (1, 1, 128); distinct
    # output block per parallel grid point -> no cross-core races.
    @pl.when(l == 0)
    def _init():
        o_ref[...] = jnp.zeros_like(o_ref)

    if needs_mask:
        # Only blocks touching padded / overcovered pixels pay for the mask.
        @pl.when(g < nb_full)
        def _acc_full():
            o_ref[...] += jnp.sum(loss, axis=1, keepdims=True)

        @pl.when(g >= nb_full)
        def _acc_tail():
            # Mask out-of-range pixels BEFORE accumulation.  Overcovered
            # blocks (grid larger than data, index_map clamped) mask to zero
            # entirely, so clamped re-reads are never double counted.
            row = jax.lax.broadcasted_iota(jnp.int32, loss.shape, 1)
            lane = jax.lax.broadcasted_iota(jnp.int32, loss.shape, 2)
            pix = (g * s_rows + row) * 128 + lane
            o_ref[...] += jnp.sum(jnp.where(pix < l_total, loss, 0.0),
                                  axis=1, keepdims=True)
    else:
        o_ref[...] += jnp.sum(loss, axis=1, keepdims=True)


def quadruplet_loss(anchor, positive, negative1, negative2,
                    margin1=2.0, margin2=1.0):
    """Pallas implementation of QuadrupletLoss.forward for NCHW inputs."""
    B, C, H, W = anchor.shape
    L = H * W
    itemsize = jnp.dtype(anchor.dtype).itemsize

    # ---- device-aware VMEM budget (feedback #4/#5/#6) ----------------------
    try:
        info = pltpu.get_tpu_info()
        vmem_cap = int(getattr(info, "vmem_capacity_bytes", 128 << 20))
    except Exception:  # pragma: no cover - be robust off-TPU / older jax
        vmem_cap = 128 << 20
    if vmem_cap <= (64 << 20):       # v7x-class: 64 MiB per TensorCore
        vmem_limit = 36 << 20
    else:                            # v5e / v6e: 128 MiB
        vmem_limit = 60 << 20
    # 4 inputs x 2 pipeline buffers of one block each, with headroom.
    block_budget = (vmem_limit * 3 // 4) // 8

    # ---- layout: (B, C, H, W) -> (B, C, R, 128), metadata-only reshape -----
    Lp = ((L + 127) // 128) * 128
    R = Lp // 128

    def _prep(t):
        t = t.reshape(B, C, L)
        if Lp != L:                      # rare ragged path: one bounded pad copy
            t = jnp.pad(t, ((0, 0), (0, 0), (0, Lp - L)))
        return t.reshape(B, C, R, 128)

    a, p, n1, n2 = map(_prep, (anchor, positive, negative1, negative2))

    # ---- sublane-row tile: multiple of 8 (or all of R), sized from budget --
    s_cap = max(1, block_budget // (C * 128 * itemsize))
    if R <= s_cap:
        s_rows = R                       # equals full dim -> always layout-legal
    else:
        s_rows = max(8, (s_cap // 8) * 8)
    # TODO(synk): for extremely large C (a single 8-row block over budget),
    # tile the channel axis with a per-pixel distance scratch as well.

    nb = pl.cdiv(R, s_rows)              # row-blocks covering the padded array
    nb_full = L // (s_rows * 128)        # row-blocks fully inside real data

    # Second parallel axis over spatial chunks (feedback #3, helps v7x 2-TC).
    n_outer = 2 if nb >= 2 else 1
    n_inner = pl.cdiv(nb, n_outer)
    needs_mask = (n_outer * n_inner) != nb_full

    in_spec = pl.BlockSpec(
        (1, C, s_rows, 128),
        # Clamp overcovered block indices so the DMA stays in bounds; the
        # kernel masks their contribution to zero using the logical index.
        lambda b, c, l: (b, 0, jnp.minimum(c * n_inner + l, nb - 1), 0))
    # Lane-dense (1, 1, 128) partial-sum block per (batch, outer chunk); the
    # trailing two dims equal the full array dims, so the store is layout-clean.
    out_spec = pl.BlockSpec((1, 1, 128),
                            lambda b, c, l: (b * n_outer + c, 0, 0))

    block_bytes = C * s_rows * 128 * itemsize
    vmem_limit = int(min(max(vmem_limit, 8 * block_bytes + (4 << 20)),
                         vmem_cap - (8 << 20)))

    kernel = functools.partial(
        _quadruplet_kernel,
        margin1=float(margin1), margin2=float(margin2),
        s_rows=s_rows, n_inner=n_inner, nb_full=nb_full,
        l_total=L, needs_mask=needs_mask)

    cost = pl.CostEstimate(
        flops=int(9 * B * C * L + 6 * B * L),
        transcendentals=0,
        bytes_accessed=int(4 * B * C * L * itemsize))

    partials = pl.pallas_call(
        kernel,
        out_shape=jax.ShapeDtypeStruct((B * n_outer, 1, 128), jnp.float32),
        grid_spec=pltpu.PrefetchScalarGridSpec(
            num_scalar_prefetch=0,
            grid=(B, n_outer, n_inner),
            in_specs=[in_spec, in_spec, in_spec, in_spec],
            out_specs=out_spec,
        ),
        compiler_params=pltpu.CompilerParams(
            dimension_semantics=("parallel", "parallel", "arbitrary"),
            vmem_limit_bytes=vmem_limit),
        cost_estimate=cost,
    )(a, p, n1, n2)

    # Single cross-lane reduce over the tiny partials buffer, done by XLA.
    total = jnp.sum(partials)
    return (total / (B * L)).astype(jnp.float32)


def quadruplet_loss_ref(anchor, positive, negative1, negative2,
                        margin1=2.0, margin2=1.0):
    d_pos = jnp.sum((anchor - positive) ** 2, axis=1)
    d_neg = jnp.sum((anchor - negative1) ** 2, axis=1)
    d_neg_b = jnp.sum((negative1 - negative2) ** 2, axis=1)
    loss = (jnp.maximum(margin1 + d_pos - d_neg, 0.0)
            + jnp.maximum(margin2 + d_pos - d_neg_b, 0.0))
    return jnp.mean(loss)


if __name__ == "__main__":
    key = jax.random.PRNGKey(0)
    k_a, k_p, k_n1, k_n2 = jax.random.split(key, 4)

    B, C, H, W = 2, 4, 16, 16   # NCHW, matching the PyTorch module
    anchor = jax.random.normal(k_a, (B, C, H, W), dtype=jnp.float32)
    positive = jax.random.normal(k_p, (B, C, H, W), dtype=jnp.float32)
    negative1 = jax.random.normal(k_n1, (B, C, H, W), dtype=jnp.float32)
    negative2 = jax.random.normal(k_n2, (B, C, H, W), dtype=jnp.float32)

    out = quadruplet_loss(anchor, positive, negative1, negative2,
                          margin1=2.0, margin2=1.0)
    out = jax.block_until_ready(out)

    ref = quadruplet_loss_ref(anchor, positive, negative1, negative2,
                              margin1=2.0, margin2=1.0)
    assert jnp.allclose(out, ref, rtol=1e-5, atol=1e-5), (out, ref)

    print("KERNEL_OK")
</pallas_src>

<mosaic_0001>
module attributes {stable_mosaic.version = 11 : i64} {
  func.func @_quadruplet_kernel(%arg0: i32, %arg1: i32, %arg2: i32, %arg3: memref<1x4x2x128xf32, #tpu.memory_space<vmem>>, %arg4: memref<1x4x2x128xf32, #tpu.memory_space<vmem>>, %arg5: memref<1x4x2x128xf32, #tpu.memory_space<vmem>>, %arg6: memref<1x4x2x128xf32, #tpu.memory_space<vmem>>, %arg7: memref<1x1x128xf32, #tpu.memory_space<vmem>>) attributes {dimension_semantics = [#tpu.dimension_semantics<parallel>, #tpu.dimension_semantics<parallel>, #tpu.dimension_semantics<arbitrary>], iteration_bounds = array<i64: 2, 1, 1>, scalar_prefetch = 0 : i64, scratch_operands = 0 : i64, tpu.core_type = #tpu.core_type<tc>, window_params = [{transform_indices = @transform_0, window_bounds = array<i64: 1, 4, 2, 128>}, {transform_indices = @transform_1, window_bounds = array<i64: 1, 4, 2, 128>}, {transform_indices = @transform_2, window_bounds = array<i64: 1, 4, 2, 128>}, {transform_indices = @transform_3, window_bounds = array<i64: 1, 4, 2, 128>}, {transform_indices = @transform_4, window_bounds = array<i64: 1, 1, 128>}]} {
    %c0 = arith.constant 0 : index
    %c0_0 = arith.constant 0 : index
    %c0_1 = arith.constant 0 : index
    %c0_2 = arith.constant 0 : index
    %0 = vector.load %arg3[%c0, %c0_0, %c0_1, %c0_2] : memref<1x4x2x128xf32, #tpu.memory_space<vmem>>, vector<1x4x2x128xf32>
    %c0_3 = arith.constant 0 : index
    %c0_4 = arith.constant 0 : index
    %c0_5 = arith.constant 0 : index
    %c0_6 = arith.constant 0 : index
    %1 = vector.load %arg4[%c0_3, %c0_4, %c0_5, %c0_6] : memref<1x4x2x128xf32, #tpu.memory_space<vmem>>, vector<1x4x2x128xf32>
    %c0_7 = arith.constant 0 : index
    %c0_8 = arith.constant 0 : index
    %c0_9 = arith.constant 0 : index
    %c0_10 = arith.constant 0 : index
    %2 = vector.load %arg5[%c0_7, %c0_8, %c0_9, %c0_10] : memref<1x4x2x128xf32, #tpu.memory_space<vmem>>, vector<1x4x2x128xf32>
    %c0_11 = arith.constant 0 : index
    %c0_12 = arith.constant 0 : index
    %c0_13 = arith.constant 0 : index
    %c0_14 = arith.constant 0 : index
    %3 = vector.load %arg6[%c0_11, %c0_12, %c0_13, %c0_14] : memref<1x4x2x128xf32, #tpu.memory_space<vmem>>, vector<1x4x2x128xf32>
    %4 = arith.subf %0, %1 : vector<1x4x2x128xf32>
    %5 = arith.mulf %4, %4 : vector<1x4x2x128xf32>
    %cst = arith.constant dense<0.000000e+00> : vector<1x2x128xf32>
    %6 = vector.multi_reduction <add>, %5, %cst [1] : vector<1x4x2x128xf32> to vector<1x2x128xf32>
    %7 = arith.subf %0, %2 : vector<1x4x2x128xf32>
    %8 = arith.mulf %7, %7 : vector<1x4x2x128xf32>
    %cst_15 = arith.constant dense<0.000000e+00> : vector<1x2x128xf32>
    %9 = vector.multi_reduction <add>, %8, %cst_15 [1] : vector<1x4x2x128xf32> to vector<1x2x128xf32>
    %10 = arith.subf %2, %3 : vector<1x4x2x128xf32>
    %11 = arith.mulf %10, %10 : vector<1x4x2x128xf32>
    %cst_16 = arith.constant dense<0.000000e+00> : vector<1x2x128xf32>
    %12 = vector.multi_reduction <add>, %11, %cst_16 [1] : vector<1x4x2x128xf32> to vector<1x2x128xf32>
    %cst_17 = arith.constant 2.000000e+00 : f32
    %13 = vector.broadcast %cst_17 : f32 to vector<1x2x128xf32>
    %14 = arith.addf %13, %6 : vector<1x2x128xf32>
    %15 = arith.subf %14, %9 : vector<1x2x128xf32>
    %cst_18 = arith.constant 0.000000e+00 : f32
    %16 = vector.broadcast %cst_18 : f32 to vector<1x2x128xf32>
    %17 = arith.maximumf %15, %16 : vector<1x2x128xf32>
    %cst_19 = arith.constant 1.000000e+00 : f32
    %18 = vector.broadcast %cst_19 : f32 to vector<1x2x128xf32>
    %19 = arith.addf %18, %6 : vector<1x2x128xf32>
    %20 = arith.subf %19, %12 : vector<1x2x128xf32>
    %cst_20 = arith.constant 0.000000e+00 : f32
    %21 = vector.broadcast %cst_20 : f32 to vector<1x2x128xf32>
    %22 = arith.maximumf %20, %21 : vector<1x2x128xf32>
    %23 = arith.addf %17, %22 : vector<1x2x128xf32>
    %c0_i32 = arith.constant 0 : i32
    %24 = arith.cmpi eq, %arg2, %c0_i32 : i32
    %25 = arith.extui %24 : i1 to i32
    %c0_i32_21 = arith.constant 0 : i32
    %26 = arith.cmpi ne, %25, %c0_i32_21 : i32
    scf.if %26 {
      %cst_29 = arith.constant 0.000000e+00 : f32
      %32 = vector.broadcast %cst_29 : f32 to vector<1x1x128xf32>
      %c0_30 = arith.constant 0 : index
      %c0_31 = arith.constant 0 : index
      %c0_32 = arith.constant 0 : index
      %33 = vector.load %arg7[%c0_30, %c0_31, %c0_32] : memref<1x1x128xf32, #tpu.memory_space<vmem>>, vector<1x1x128xf32>
      tpu.vector_store %arg7[%c0_30, %c0_31, %c0_32], %32 {strides = array<i32>} : memref<1x1x128xf32, #tpu.memory_space<vmem>>, vector<1x1x128xf32>,
    } else {
    }
    %c0_22 = arith.constant 0 : index
    %c0_23 = arith.constant 0 : index
    %c0_24 = arith.constant 0 : index
    %27 = vector.load %arg7[%c0_22, %c0_23, %c0_24] : memref<1x1x128xf32, #tpu.memory_space<vmem>>, vector<1x1x128xf32>
    %cst_25 = arith.constant dense<0.000000e+00> : vector<1x128xf32>
    %28 = vector.multi_reduction <add>, %23, %cst_25 [1] : vector<1x2x128xf32> to vector<1x128xf32>
    %29 = vector.shape_cast %28 : vector<1x128xf32> to vector<1x1x128xf32>
    %30 = arith.addf %27, %29 : vector<1x1x128xf32>
    %c0_26 = arith.constant 0 : index
    %c0_27 = arith.constant 0 : index
    %c0_28 = arith.constant 0 : index
    %31 = vector.load %arg7[%c0_26, %c0_27, %c0_28] : memref<1x1x128xf32, #tpu.memory_space<vmem>>, vector<1x1x128xf32>
    tpu.vector_store %arg7[%c0_26, %c0_27, %c0_28], %30 {strides = array<i32>} : memref<1x1x128xf32, #tpu.memory_space<vmem>>, vector<1x1x128xf32>,
    return
  }
  func.func @transform_0(%arg0: i32, %arg1: i32, %arg2: i32) -> (i32, i32, i32, i32) {
    %c1_i32 = arith.constant 1 : i32
    %0 = arith.muli %arg1, %c1_i32 : i32
    %1 = arith.addi %0, %arg2 : i32
    %c0_i32 = arith.constant 0 : i32
    %2 = arith.minsi %1, %c0_i32 : i32
    %c0_i32_0 = arith.constant 0 : i32
    %c0_i32_1 = arith.constant 0 : i32
    %c0_i32_2 = arith.constant 0 : i32
    return %arg0, %c0_i32_0, %2, %c0_i32_1 : i32, i32, i32, i32
  }
  func.func @transform_1(%arg0: i32, %arg1: i32, %arg2: i32) -> (i32, i32, i32, i32) {
    %c1_i32 = arith.constant 1 : i32
    %0 = arith.muli %arg1, %c1_i32 : i32
    %1 = arith.addi %0, %arg2 : i32
    %c0_i32 = arith.constant 0 : i32
    %2 = arith.minsi %1, %c0_i32 : i32
    %c0_i32_0 = arith.constant 0 : i32
    %c0_i32_1 = arith.constant 0 : i32
    %c0_i32_2 = arith.constant 0 : i32
    return %arg0, %c0_i32_0, %2, %c0_i32_1 : i32, i32, i32, i32
  }
  func.func @transform_2(%arg0: i32, %arg1: i32, %arg2: i32) -> (i32, i32, i32, i32) {
    %c1_i32 = arith.constant 1 : i32
    %0 = arith.muli %arg1, %c1_i32 : i32
    %1 = arith.addi %0, %arg2 : i32
    %c0_i32 = arith.constant 0 : i32
    %2 = arith.minsi %1, %c0_i32 : i32
    %c0_i32_0 = arith.constant 0 : i32
    %c0_i32_1 = arith.constant 0 : i32
    %c0_i32_2 = arith.constant 0 : i32
    return %arg0, %c0_i32_0, %2, %c0_i32_1 : i32, i32, i32, i32
  }
  func.func @transform_3(%arg0: i32, %arg1: i32, %arg2: i32) -> (i32, i32, i32, i32) {
    %c1_i32 = arith.constant 1 : i32
    %0 = arith.muli %arg1, %c1_i32 : i32
    %1 = arith.addi %0, %arg2 : i32
    %c0_i32 = arith.constant 0 : i32
    %2 = arith.minsi %1, %c0_i32 : i32
    %c0_i32_0 = arith.constant 0 : i32
    %c0_i32_1 = arith.constant 0 : i32
    %c0_i32_2 = arith.constant 0 : i32
    return %arg0, %c0_i32_0, %2, %c0_i32_1 : i32, i32, i32, i32
  }
  func.func @transform_4(%arg0: i32, %arg1: i32, %arg2: i32) -> (i32, i32, i32) {
    %c1_i32 = arith.constant 1 : i32
    %0 = arith.muli %arg0, %c1_i32 : i32
    %1 = arith.addi %0, %arg1 : i32
    %c0_i32 = arith.constant 0 : i32
    %c0_i32_0 = arith.constant 0 : i32
    %c0_i32_1 = arith.constant 0 : i32
    return %1, %c0_i32, %c0_i32_0 : i32, i32, i32
  }
}

</mosaic_0001>

<bundles_post_ra>
// kernel: tpu_custom_call.1
= control target key start
LH: loop header
LB: loop body
LE: loop exit
PB: predicated region body
PF: predicated region fallthrough
CT: control target
= control target key end

     0   :  { %s1359_s0 = inlined_call_operand.hbm [shape: f32[2,4,2,128], index: 0, kind: input, shape index: {}]   ;;  %s1360_s1 = inlined_call_operand.hbm [shape: f32[2,4,2,128], index: 1, kind: input, shape index: {}]   ;;  %s1361_s2 = inlined_call_operand.hbm [shape: f32[2,4,2,128], index: 2, kind: input, shape index: {}]   ;;  %s1362_s3 = inlined_call_operand.hbm [shape: f32[2,4,2,128], index: 3, kind: input, shape index: {}]   ;;  %s1363_s4 = inlined_call_operand.hbm [shape: f32[2,1,128], index: 4, kind: output, shape index: {}]  }
   0x1   :  { %1375 = sst [smem:[#allocation20_spill]] %s1359_s0 }
   0x2   :  { %1376 = sst [smem:[#allocation21_spill]] %s1360_s1 }
   0x3   :  { %9 = vsyncpa [#allocation3], 0 }
   0x4   :  { %11 = vsyncpa [#allocation3 + $0x1], 0 }
   0x5   :  { %12 = vsyncpa [#allocation6], 0 }
   0x6   :  { %14 = vsyncpa [#allocation6 + $0x1], 0 }
   0x7   :  { %15 = vsyncpa [#allocation9], 0 }
   0x8   :  { %17 = vsyncpa [#allocation9 + $0x1], 0 }
   0x9   :  { %18 = vsyncpa [#allocation4], 0 }
   0xa   :  { %20 = vsyncpa [#allocation4 + $0x1], 0  ;;  %s1017_s15 = smov 0   ;;  %s1019_s16 = smov 0  }
   0xb   :  { %s1021_s17 = smov 0   ;;  %s1023_s18 = smov 0  }
   0xc   :  { %s1025_s19 = smov 0   ;;  %s1027_s20 = smov 0  }
   0xd LB: > { %1377 = sst [smem:[#allocation15_spill]] %s970_s17  ;;  %s1048_s21 = sadd.s32 4294967295, %s982_s20   ;;  %s982_s20 = sphi %s1027_s20, %s26_s20   ;;  %s978_s19 = sphi %s1025_s19, %s1404_s19   ;;  %s974_s18 = sphi %s1023_s18, %s1403_s18   ;;  %s970_s17 = sphi %s1021_s17, %s1402_s17   ;;  %s966_s16 = sphi %s1019_s16, %s1406_s16   ;;  %s962_s15 = sphi %s1017_s15, %s1405_s15  }
   0xe   : > { %1378 = sst [smem:[#allocation16_spill]] %s978_s19  ;;  %s665_s22 = sadd.s32 4294967294, %s982_s20  }
   0xf   : > { %1379 = sst [smem:[#allocation17_spill]] %s982_s20  ;;  %s45_s23 = sadd.s32 1, %s978_s19 }
  0x10   : > { %s60_s24 = sadd.s32 1, %s970_s17  ;;  %p47_p0 = scmp.ge.s32.totalorder %s45_s23, 2 }
  0x11   : > { %p67_p1 = scmp.ne.s32.totalorder %s970_s17, %s966_s16  ;;  %p68_p2 = scmp.eq.s32.totalorder %s982_s20, 0 }
  0x12   : > { %p73_p3 = scmp.ne.s32.totalorder %s966_s16, %s962_s15  ;;  %s1408_s23 = smov (%p47_p0, %s45_s23), 0 }
  0x13   : > { %1380 = sst [smem:[#allocation18_spill]] %s1408_s23  ;;  %p1060_p4 = por %p68_p2, %p67_p1 }
  0x14   : > { %p74_p5 = scmp.eq.s32.totalorder %s1048_s21, 0  ;;  %s55_s26 = ssub.s32 %s978_s19, %s1408_s23 }
  0x15   : > { %p201_p6 = scmp.eq.s32.totalorder %s1048_s21, 1  ;;  %p58_p7 = scmp.eq.s32.totalorder %s55_s26, 0 }
  0x16   : > { %p1068_p8 = por %p74_p5, %p73_p3  ;;  %p207_p10 = scmp.eq.s32.totalorder %s665_s22, 1 }
  0x17   : > { %p1072_p9 = por %p201_p6, %p67_p1  ;;  %p719_p13 = scmp.lt.s32.totalorder %s982_s20, 2 }
  0x18   : > { %s1382_s27 = scalar_select %p1068_p8, 1, 0 }
  0x19   : > { %s1383_s28 = scalar_select %p1072_p9, 1, 0 }
  0x1a   : > { %s1077_s29 = scalar_select %p58_p7, %s970_s17, %s60_s24  }
  0x1b   : > { %p1079_p11 = por %p207_p10, %p73_p3  ;;  %s1086_s5 = sand.u32 1, %s970_s17  }
  0x1c   : > { %1384 = sst [smem:[#allocation19_spill]] %s1077_s29  ;;  %s1089_s6 = sshll.u32 %s1086_s5, 3 }
  0x1d   : > { %s1385_s30 = scalar_select %p1079_p11, 1, 0 }
  0x1e   : > { %s1092_s7 = sshll.u32 %s978_s19, 7  ;;  %p1096_p0 = pnand %p719_p13, %p1060_p4 }
  0x1f   : > { %s252_s9 = sand.u32 1, %s982_s20   ;;  %s1387_s1 = sld [smem:[#allocation21_spill]] }
  0x20   : > { %s256_s13 = scalar_lea.vmem [#allocation5], %s1089_s6  ;;  %s1112_s22 = scalar_lea.sflag [#allocation6], %s252_s9 }
  0x21   : > { %s267_s14 = sshll.u32 %s256_s13, 4  ;;  %p1118_p4 = pneg %p1096_p0  ;;  %s1109_s14 = int_to_ptr.vmem [resolvable:$true] %s267_s14 }
  0x25   : > { %s1105_s12 = scalar_lea.hbm %s1387_s1, %s1092_s7  ;;  %s777_s11 = scalar_lea.hbm %s1387_s1, 256 }
  0x26   : > { %s772_s24 = scalar_lea.hbm %s1105_s12, 128  ;;  %p778_p7 = scmp.lt.u32.totalorder %s1105_s12, %s1387_s1 }
  0x27   : > { %p773_p3 = scmp.ne.s32.totalorder %s1105_s12, %s772_s24  ;;  %p779_p10 = scmp.lt.u32.totalorder %s777_s11, %s772_s24 }
  0x28   : > { %p781_p12 = scmp.lt.u32.totalorder %s772_s24, %s1105_s12 }
  0x29   : > { %p775_p5 = pnand %p1118_p4, %p773_p3  ;;  %p780_p13 = por %p779_p10, %p778_p7 }
  0x2b   : > { %p776_p6 = pneg %p775_p5  ;;  %p782_p1 = por %p781_p12, %p780_p13 }
  0x2d   : > { %p783_p2 = pnand %p782_p1, %p776_p6 }
  0x2f   : > { %786 = shalt.err (!%p783_p2)
}
  0x30   : > { %s787_s9 = scalar_lea.vmem %s1109_s14, 128  ;;  %s984_s26 = smov [#allocation5]  }
  0x31   : > { %p788_p3 = scmp.ne.s32.totalorder %s1109_s14, %s787_s9  ;;  %s792_s10 = sshll.u32 %s984_s26, 4  ;;  %s793_s10 = int_to_ptr.vmem [resolvable:$false] %s792_s10 }
  0x32   : > { %s794_s23 = scalar_lea.vmem %s793_s10, 256  ;;  %p795_p9 = scmp.lt.s32.totalorder %s1109_s14, %s793_s10 }
  0x33   : > { %p790_p5 = pnand %p788_p3, %p1118_p4  ;;  %p796_p8 = scmp.lt.s32.totalorder %s794_s23, %s787_s9 }
  0x35   : > { %p791_p11 = pneg %p790_p5  ;;  %p797_p7 = por %p796_p8, %p795_p9 }
  0x37   : > { %p798_p10 = pnand %p797_p7, %p791_p11 }
  0x39   : > { %801 = shalt.err (!%p798_p10)
}
  0x3a   : > { %s1367_s24 = smov 32   ;;  %s1369_s11 = smov 2  }
  0x3b   : > { %708 = dma.hbm_to_vmem [thread:$0]  (!%p1096_p0), %s1105_s12, 128, %s1109_s14, %s1112_s22, %s1367_s24, %s1367_s24, %s1369_s11  }
  0x3c   : > { %p1389_p8 = scmp.lt.s32.totalorder %s982_s20, 3  ;;  %p1390_p9 = scmp.ge.s32.totalorder %s982_s20, 1 }
  0x3d   : > { %s1392_s0 = sld [smem:[#allocation20_spill]]  ;;  %s231_s23 = scalar_lea.vmem [#allocation2], %s1089_s6 }
  0x3e   : > { %p1149_p11 = pnand %p1390_p9, %p1389_p8  ;;  %s242_s1 = sshll.u32 %s231_s23, 4  ;;  %s1160_s1 = int_to_ptr.vmem [resolvable:$true] %s242_s1 }
  0x3f   : > { %s1166_s24 = scalar_lea.hbm %s1361_s2, %s1092_s7  ;;  %s228_s11 = scalar_lea.sflag [#allocation3], %s1086_s5 }
  0x40   : > { %s1391_s13 = scalar_select %p1149_p11, 1, 0 }
  0x43   : > { %s1157_s10 = scalar_lea.hbm %s1392_s0, %s1092_s7  ;;  %s807_s29 = scalar_lea.hbm %s1392_s0, 256 }
  0x44   : > { %s802_s19 = scalar_lea.hbm %s1157_s10, 128  ;;  %p808_p6 = scmp.lt.u32.totalorder %s1157_s10, %s1392_s0 }
  0x45   : > { %p803_p12 = scmp.ne.s32.totalorder %s1157_s10, %s802_s19  ;;  %p809_p13 = scmp.lt.u32.totalorder %s807_s29, %s802_s19 }
  0x46   : > { %p811_p5 = scmp.lt.u32.totalorder %s802_s19, %s1157_s10 }
  0x47   : > { %p805_p1 = pnand %p803_p12, %p1118_p4  ;;  %p810_p3 = por %p809_p13, %p808_p6 }
  0x49   : > { %p806_p2 = pneg %p805_p1  ;;  %p812_p7 = por %p811_p5, %p810_p3 }
  0x4b   : > { %p813_p10 = pnand %p812_p7, %p806_p2 }
  0x4d   : > { %816 = shalt.err (!%p813_p10)
}
  0x4e   : > { %s817_s23 = scalar_lea.vmem %s1160_s1, 128  ;;  %s987_s12 = smov [#allocation2]  }
  0x4f   : > { %p818_p8 = scmp.ne.s32.totalorder %s1160_s1, %s817_s23  ;;  %s822_s14 = sshll.u32 %s987_s12, 4  ;;  %s823_s14 = int_to_ptr.vmem [resolvable:$false] %s822_s14 }
  0x50   : > { %s824_s17 = scalar_lea.vmem %s823_s14, 256  ;;  %p825_p1 = scmp.lt.s32.totalorder %s1160_s1, %s823_s14 }
  0x51   : > { %p820_p9 = pnand %p818_p8, %p1118_p4  ;;  %p826_p11 = scmp.lt.s32.totalorder %s824_s17, %s817_s23 }
  0x53   : > { %p821_p12 = pneg %p820_p9  ;;  %p827_p6 = por %p826_p11, %p825_p1 }
  0x55   : > { %p828_p13 = pnand %p827_p6, %p821_p12 }
  0x57   : > { %831 = shalt.err (!%p828_p13)
}
  0x58   : > { %s1393_s19 = smov 2   ;;  %s1394_s20 = smov 32  }
  0x59   : > { %705 = dma.hbm_to_vmem [thread:$0]  (!%p1096_p0), %s1157_s10, 128, %s1160_s1, %s228_s11, %s1394_s20, %s1394_s20, %s1393_s19  }
  0x5a   : > { %s281_s29 = scalar_lea.vmem [#allocation7], %s1089_s6  ;;  %s832_s26 = scalar_lea.hbm %s1166_s24, 128 }
  0x5b   : > { %s292_s9 = sshll.u32 %s281_s29, 4  ;;  %p833_p11 = scmp.ne.s32.totalorder %s1166_s24, %s832_s26  ;;  %s1196_s9 = int_to_ptr.vmem [resolvable:$true] %s292_s9 }
  0x5c   : > { %s837_s14 = scalar_lea.hbm %s1361_s2, 256  ;;  %p838_p5 = scmp.lt.u32.totalorder %s1166_s24, %s1361_s2 }
  0x5d   : > { %p835_p2 = pnand %p833_p11, %p1118_p4  ;;  %p839_p7 = scmp.lt.u32.totalorder %s837_s14, %s832_s26 }
  0x5e   : > { %p841_p8 = scmp.lt.u32.totalorder %s832_s26, %s1166_s24 }
  0x5f   : > { %p836_p3 = pneg %p835_p2  ;;  %p840_p10 = por %p839_p7, %p838_p5 }
  0x61   : > { %p842_p9 = por %p841_p8, %p840_p10 }
  0x63   : > { %p843_p12 = pnand %p842_p9, %p836_p3 }
  0x65   : > { %846 = shalt.err (!%p843_p12)
}
  0x66   : > { %s847_s1 = scalar_lea.vmem %s1196_s9, 128  ;;  %s988_s11 = smov [#allocation7]  }
  0x67   : > { %p848_p1 = scmp.ne.s32.totalorder %s1196_s9, %s847_s1  ;;  %s852_s10 = sshll.u32 %s988_s11, 4  ;;  %s853_s10 = int_to_ptr.vmem [resolvable:$false] %s852_s10 }
  0x68   : > { %s854_s0 = scalar_lea.vmem %s853_s10, 256  ;;  %p855_p11 = scmp.lt.s32.totalorder %s1196_s9, %s853_s10 }
  0x69   : > { %p850_p6 = pnand %p848_p1, %p1118_p4  ;;  %p856_p2 = scmp.lt.s32.totalorder %s854_s0, %s847_s1 }
  0x6b   : > { %p851_p13 = pneg %p850_p6  ;;  %p857_p5 = por %p856_p2, %p855_p11 }
  0x6d   : > { %p858_p7 = pnand %p857_p5, %p851_p13 }
  0x6f   : > { %861 = shalt.err (!%p858_p7)
}
  0x70   : > { %711 = dma.hbm_to_vmem [thread:$0]  (!%p1096_p0), %s1166_s24, 128, %s1196_s9, %s1112_s22, %s1394_s20, %s1394_s20, %s1393_s19  }
  0x71   : > { %s1227_s23 = scalar_lea.hbm %s1362_s3, %s1092_s7  ;;  %s306_s12 = scalar_lea.vmem [#allocation8], %s1089_s6 }
  0x72   : > { %s317_s14 = sshll.u32 %s306_s12, 4  ;;  %s303_s17 = scalar_lea.sflag [#allocation9], %s1086_s5  ;;  %s1230_s14 = int_to_ptr.vmem [resolvable:$true] %s317_s14 }
  0x73   : > { %s862_s1 = scalar_lea.hbm %s1227_s23, 128  ;;  %s867_s9 = scalar_lea.hbm %s1362_s3, 256 }
  0x74   : > { %p863_p3 = scmp.ne.s32.totalorder %s1227_s23, %s862_s1  ;;  %p868_p9 = scmp.lt.u32.totalorder %s1227_s23, %s1362_s3 }
  0x75   : > { %p869_p12 = scmp.lt.u32.totalorder %s867_s9, %s862_s1  ;;  %p871_p6 = scmp.lt.u32.totalorder %s862_s1, %s1227_s23 }
  0x76   : > { %p865_p10 = pnand %p863_p3, %p1118_p4 }
  0x77   : > { %p870_p1 = por %p869_p12, %p868_p9 }
  0x78   : > { %p866_p8 = pneg %p865_p10 }
  0x79   : > { %p872_p13 = por %p871_p6, %p870_p1 }
  0x7b   : > { %p873_p11 = pnand %p872_p13, %p866_p8 }
  0x7d   : > { %876 = shalt.err (!%p873_p11)
}
  0x7e   : > { %s877_s6 = scalar_lea.vmem %s1230_s14, 128  ;;  %s989_s10 = smov [#allocation8]  }
  0x7f   : > { %p878_p2 = scmp.ne.s32.totalorder %s1230_s14, %s877_s6  ;;  %s882_s0 = sshll.u32 %s989_s10, 4  ;;  %s883_s0 = int_to_ptr.vmem [resolvable:$false] %s882_s0 }
  0x80   : > { %s884_s29 = scalar_lea.vmem %s883_s0, 256  ;;  %p885_p3 = scmp.lt.s32.totalorder %s1230_s14, %s883_s0 }
  0x81   : > { %p880_p5 = pnand %p878_p2, %p1118_p4  ;;  %p886_p10 = scmp.lt.s32.totalorder %s884_s29, %s877_s6 }
  0x83   : > { %p881_p7 = pneg %p880_p5  ;;  %p887_p9 = por %p886_p10, %p885_p3 }
  0x85   : > { %p888_p12 = pnand %p887_p9, %p881_p7 }
  0x87   : > { %891 = shalt.err (!%p888_p12)
}
  0x88   : > { %714 = dma.hbm_to_vmem [thread:$0]  (!%p1096_p0), %s1227_s23, 128, %s1230_s14, %s303_s17, %s1394_s20, %s1394_s20, %s1393_s19  }
  0x89   : > { %p1395_p4 = scmp.ne.s32.totalorder %s1391_s13, 0 }
  0x8a   : > { %s1262_s25 = sand.u32 (!%p1395_p4), 1, %s966_s16   ;;  %p1396_p8 = scmp.ne.s32.totalorder (!%p1395_p4), %s1382_s27, 0 }
  0x8b   : > { %329 = sbr.rel (%p1395_p4) target bundleno = 209 (0xd1), region = 36  ;;  %s681_s26 = sshll.u32 (!%p1395_p4), %s1262_s25, 3 }
  0x8c   : > { %s332_s12 = scalar_lea.sflag (!%p1395_p4), [#allocation3], %s1262_s25  ;;  %s335_s8 = scalar_lea.vmem (!%p1395_p4), [#allocation2], %s681_s26 }
  0x92   : > { %945 = dma.done.wait (%p1396_p8), %s332_s12, 128  }
  0x93   : > { %947 = vsyncadd (%p1396_p8), %s332_s12, 4294967168  ;;  %s340_s5 = sand.u32 1, %s1048_s21   ;;  %s344_s13 = scalar_lea.vmem [#allocation5], %s681_s26 }
  0x94   : > { %s341_s19 = scalar_lea.sflag [#allocation6], %s340_s5 }
  0x95   : > { %949 = dma.done.wait (%p1396_p8), %s341_s19, 256  }
  0x96   : > { %951 = vsyncadd (%p1396_p8), %s341_s19, 4294967040  ;;  %s353_s20 = scalar_lea.vmem [#allocation7], %s681_s26  ;;  %s359_s23 = scalar_lea.sflag [#allocation9], %s1262_s25 }
  0x97   : > { %s1276_s14 = scalar_lea.vmem [#allocation8], %s681_s26 }
  0x98   : > { %953 = dma.done.wait (%p1396_p8), %s359_s23, 128  }
  0x99   : > { %955 = vsyncadd (%p1396_p8), %s359_s23, 4294967168  ;;  %s1283_s21 = scalar_lea.vmem [#allocation10], %s1262_s25  ;;  %v990_v0 = vmov 0.0   ;;  %vm438_vm0 = vcmask 1041408   ;;  %v414_v1 = vld [vmem:[%s335_s8] sm:$0x3] }
  0x9a   : > { %487 = vst [vmem:[%s1283_s21] sm:$0x1] %v990_v0  ;;  %v415_v2 = vld [vmem:[%s335_s8 + $0x2] sm:$0x3]  ;;  %v416_v3 = vld [vmem:[%s335_s8 + $0x4] sm:$0x3]  ;;  %s685_s27 = sshll.u32 %s974_s18, 4 }
  0x9b   : > { %v417_v4 = vld [vmem:[%s335_s8 + $0x6] sm:$0x3]  ;;  %v418_v5 = vld [vmem:[%s344_s13] sm:$0x3]  ;;  %v419_v6 = vld [vmem:[%s344_s13 + $0x2] sm:$0x3]  ;;  %s1309_s24 = scalar_lea.hbm %s1363_s4, %s685_s27 }
  0x9c   : > { %v420_v7 = vld [vmem:[%s344_s13 + $0x4] sm:$0x3]  ;;  %v421_v8 = vld [vmem:[%s344_s13 + $0x6] sm:$0x3]  ;;  %v422_v9 = vld [vmem:[%s353_s20] sm:$0x3]  ;;  %v430_v10 = vsub.f32 %v414_v1, %v418_v5  ;;  %v431_v11 = vsub.f32 %v415_v2, %v419_v6 }
  0x9d   : > { %v423_v12 = vld [vmem:[%s353_s20 + $0x2] sm:$0x3]  ;;  %v424_v13 = vld [vmem:[%s353_s20 + $0x4] sm:$0x3]  ;;  %v425_v14 = vld [vmem:[%s353_s20 + $0x6] sm:$0x3]  ;;  %v432_v15 = vsub.f32 %v416_v3, %v420_v7  ;;  %v433_v16 = vsub.f32 %v417_v4, %v421_v8  ;;  %v446_v17 = vsub.f32 %v414_v1, %v422_v9 }
  0x9e   : > { %v434_v18 = vmul.f32 %v430_v10, %v430_v10  ;;  %v435_v19 = vmul.f32 %v431_v11, %v431_v11  ;;  %v447_v20 = vsub.f32 %v415_v2, %v423_v12  ;;  %v448_v21 = vsub.f32 %v416_v3, %v424_v13  ;;  %v426_v22 = vld [vmem:[%s1276_s14] sm:$0x3]  ;;  %v427_v27 = vld [vmem:[%s1276_s14 + $0x2] sm:$0x3]  ;;  %v428_v32 = vld [vmem:[%s1276_s14 + $0x4] sm:$0x3] }
  0x9f   : > { %v436_v23 = vmul.f32 %v432_v15, %v432_v15  ;;  %v437_v24 = vmul.f32 %v433_v16, %v433_v16  ;;  %v449_v25 = vsub.f32 %v417_v4, %v425_v14  ;;  %v450_v26 = vmul.f32 %v446_v17, %v446_v17  ;;  %v429_v33 = vld [vmem:[%s1276_s14 + $0x6] sm:$0x3]  ;;  %s512_s17 = sshll.u32 %s1283_s21, 4  ;;  %s499_s9 = scalar_lea.sflag [#allocation4], %s1262_s25  ;;  %s1311_s17 = int_to_ptr.vmem [resolvable:$true] %s512_s17 }
  0xa0   : > { %v439_v28 = vsel %vm438_vm0, %v434_v18, 0.0  ;;  %v440_v29 = vsel %vm438_vm0, %v435_v19, 0.0  ;;  %v451_v30 = vmul.f32 %v447_v20, %v447_v20  ;;  %v452_v31 = vmul.f32 %v448_v21, %v448_v21  ;;  %s892_s7 = scalar_lea.vmem %s1311_s17, 16  ;;  %p1397_p1 = scmp.ne.s32.totalorder %s1383_s28, 0 }
  0xa1   : > { %v441_v34 = vadd.f32 %v440_v29, %v439_v28  ;;  %v442_v35 = vsel %vm438_vm0, %v436_v23, 0.0  ;;  %v444_v36 = vsel %vm438_vm0, %v437_v24, 0.0  ;;  %v453_v37 = vmul.f32 %v449_v25, %v449_v25  ;;  %v488_v11 = vld [vmem:[%s1283_s21] sm:$0x1]  ;;  %p893_p0 = scmp.ne.s32.totalorder %s1311_s17, %s892_s7  ;;  %s991_s18 = smov [#allocation10]  }
  0xa2   : > { %v454_v38 = vsel %vm438_vm0, %v450_v26, 0.0  ;;  %v455_v39 = vsel %vm438_vm0, %v451_v30, 0.0  ;;  %v457_v40 = vsel %vm438_vm0, %v452_v31, 0.0  ;;  %v461_v41 = vsub.f32 %v422_v9, %v426_v22  ;;  %s896_s11 = sshll.u32 %s991_s18, 4  ;;  %s897_s11 = int_to_ptr.vmem [resolvable:$false] %s896_s11 }
  0xa3   : > { %v443_v42 = vadd.f32 %v442_v35, %v441_v34  ;;  %v456_v43 = vadd.f32 %v455_v39, %v454_v38  ;;  %v462_v44 = vsub.f32 %v423_v12, %v427_v27  ;;  %v459_v45 = vsel %vm438_vm0, %v453_v37, 0.0  ;;  %p894_p6 = pnand %p893_p0, %p1397_p1  ;;  %s898_s6 = scalar_lea.vmem %s897_s11, 32 }
  0xa4   : > { %v463_v46 = vsub.f32 %v424_v13, %v428_v32  ;;  %v464_v47 = vsub.f32 %v425_v14, %v429_v33  ;;  %v465_v48 = vmul.f32 %v461_v41, %v461_v41  ;;  %p899_p11 = scmp.lt.s32.totalorder %s1311_s17, %s897_s11  ;;  %p900_p2 = scmp.lt.s32.totalorder %s898_s6, %s892_s7 }
  0xa5   : > { %v445_v49 = vadd.f32 %v444_v36, %v443_v42  ;;  %v458_v50 = vadd.f32 %v457_v40, %v456_v43  ;;  %v466_v51 = vmul.f32 %v462_v44, %v462_v44  ;;  %p895_p13 = pneg %p894_p6 }
  0xa6   : > { %v467_v52 = vmul.f32 %v463_v46, %v463_v46  ;;  %v468_v53 = vmul.f32 %v464_v47, %v464_v47  ;;  %v469_v54 = vsel %vm438_vm0, %v465_v48, 0.0  ;;  %p901_p5 = por %p900_p2, %p899_p11 }
  0xa7   : > { %v460_v55 = vadd.f32 %v459_v45, %v458_v50  ;;  %v470_v56 = vsel %vm438_vm0, %v466_v51, 0.0  ;;  %v476_v57 = vadd.f32 2.0, %v445_v49  ;;  %v479_v63 = vadd.f32 1.0, %v445_v49 }
  0xa8   : > { %v471_v58 = vadd.f32 %v470_v56, %v469_v54  ;;  %v472_v59 = vsel %vm438_vm0, %v467_v52, 0.0  ;;  %v474_v60 = vsel %vm438_vm0, %v468_v53, 0.0  ;;  %p902_p7 = pnand %p901_p5, %p895_p13 }
  0xa9   : > { %v477_v62 = vsub.f32 %v476_v57, %v460_v55 }
  0xaa   : > { %v473_v61 = vadd.f32 %v472_v59, %v471_v58 }
  0xab   : > { %v478_v1 = vmax.f32 %v477_v62, 0.0 }
  0xac   : > { %v475_v0 = vadd.f32 %v474_v60, %v473_v61 }
  0xae   : > { %v480_v2 = vsub.f32 %v479_v63, %v475_v0 }
  0xb0   : > { %v481_v3 = vmax.f32 %v480_v2, 0.0 }
  0xb2   : > { %v482_v4 = vadd.f32 %v481_v3, %v478_v1 }
  0xb4   : > { %v489_v5 = vsel %vm438_vm0, %v482_v4, 0.0 }
  0xb5   : > { %v490_v6 = vrot.slane %v489_v5, 4 }
  0xb7   : > { %v491_v7 = vadd.f32 %v490_v6, %v489_v5 }
  0xb9   : > { %v492_v8 = vrot.slane %v491_v7, 2 }
  0xbb   : > { %v493_v9 = vadd.f32 %v492_v8, %v491_v7 }
  0xbd   : > { %v494_v10 = vrot.slane %v493_v9, 1 }
  0xbf   : > { %v495_v12 = vadd.f32 %v494_v10, %v493_v9 }
  0xc1   : > { %v496_v13 = vadd.f32 %v495_v12, %v488_v11 }
  0xc3   : > { %497 = vst [vmem:[%s1283_s21] sm:$0x1] %v496_v13 }
  0xc4   : > { %905 = shalt.err (!%p902_p7)
}
  0xc5   : > { %s906_s10 = scalar_lea.hbm %s1309_s24, 16  ;;  %s910_s25 = scalar_lea.hbm %s1363_s4, 32 }
  0xc6   : > { %p907_p3 = scmp.ne.s32.totalorder %s1309_s24, %s906_s10  ;;  %p911_p12 = scmp.lt.u32.totalorder %s1309_s24, %s1363_s4 }
  0xc7   : > { %p912_p4 = scmp.lt.u32.totalorder %s910_s25, %s906_s10  ;;  %p914_p0 = scmp.lt.u32.totalorder %s906_s10, %s1309_s24 }
  0xc8   : > { %p908_p10 = pnand %p907_p3, %p1397_p1 }
  0xc9   : > { %p913_p8 = por %p912_p4, %p911_p12 }
  0xca   : > { %p909_p9 = pneg %p908_p10 }
  0xcb   : > { %p915_p6 = por %p914_p0, %p913_p8 }
  0xcd   : > { %p916_p13 = pnand %p915_p6, %p909_p9 }
  0xcf   : > { %919 = shalt.err (!%p916_p13)
}
  0xd0   : > { %700 = dma.vmem_to_hbm [thread:$0]  (%p1397_p1), %s1311_s17, 16, %s1309_s24, %s499_s9  }
  0xd1 PF: > { %s1398_s8 = sld [smem:[#allocation17_spill]]  ;;  %s524_s5 = sand.u32 1, %s962_s15  }
  0xd2   : > { %p1399_p11 = scmp.ne.s32.totalorder %s1385_s30, 0  ;;  %s525_s19 = scalar_lea.sflag [#allocation4], %s524_s5 }
  0xd7   : > { %p1400_p2 = scmp.ge.s32.totalorder %s1398_s8, 2 }
  0xd9   : > { %p716_p5 = pnand %p1400_p2, %p1399_p11 }
  0xdb   : > { %957 = dma.done.wait (!%p716_p5), %s525_s19, 16  }
  0xdc   : > { %959 = vsyncadd (!%p716_p5), %s525_s19, 4294967280  ;;  %s26_s20 = sadd.s32 1, %s1398_s8   ;;  %s1401_s13 = sld [smem:[#allocation15_spill]] }
  0xdd   : > { %p23_p7 = scmp.ge.s32.totalorder %s26_s20, 4   ;;  %s1402_s17 = sld [smem:[#allocation19_spill]] }
  0xde   : > { %s1403_s18 = sld [smem:[#allocation16_spill]]  ;;  %s1404_s19 = sld [smem:[#allocation18_spill]] }
  0xdf   : > { %s1405_s15 = smov %s966_s16  ;;  %25 = sbr.rel (!%p23_p7) target bundleno = 13 (0xd), region = 122 }
  0xe2   : > { %s1406_s16 = smov %s1401_s13 }
  0xe6   :  { %529 = vsyncpa [#allocation3], 1 }
  0xe7   :  { %531 = vsyncpa [#allocation3 + $0x1], 1 }
  0xe8   :  { %532 = vsyncpa [#allocation6], 1 }
  0xe9   :  { %534 = vsyncpa [#allocation6 + $0x1], 1 }
  0xea   :  { %535 = vsyncpa [#allocation9], 1 }
  0xeb   :  { %537 = vsyncpa [#allocation9 + $0x1], 1 }
  0xec   :  { %538 = vsyncpa [#allocation4], 1 }
  0xed   :  { %540 = vsyncpa [#allocation4 + $0x1], 1 }

</bundles_post_ra>
